<compile_context>
chip_gen: v7x
topology: tpu7x:2x2x1
jax: 0.10.0
libtpu: 0.0.40
codegen_flags: <defaults>
</compile_context>

<pallas_src>
import functools

import jax
import jax.numpy as jnp
from jax.experimental import pallas as pl
from jax.experimental.pallas import tpu as pltpu


def _round_up(x, m):
    return ((x + m - 1) // m) * m


def _focal_loss_kernel(logit_ref, target_ref, alpha_ref, out_ref, acc_ref,
                       *, smooth, gamma, fuse_softmax, valid_lanes,
                       needs_mask):
    j = pl.program_id(1)

    @pl.when(j == 0)
    def _():
        acc_ref[...] = jnp.zeros_like(acc_ref)

    x = logit_ref[...]            # (C, TL) f32 : classes on sublanes, lanes dense
    tgt = target_ref[...]         # (1, TL) i32
    alpha = alpha_ref[...]        # (C, 1)  f32

    num_class = x.shape[0]

    if fuse_softmax:
        # Numerically stable softmax over the (small) class/sublane axis.
        # exp goes to the EUP; the reductions are cheap sublane reduces.
        m = jnp.max(x, axis=0, keepdims=True)
        e = jnp.exp(x - m)
        prob = e / jnp.sum(e, axis=0, keepdims=True)
    else:
        prob = x

    # one-hot key via sublane-iota compare (replaces torch scatter_)
    cls_iota = jax.lax.broadcasted_iota(jnp.int32, prob.shape, 0)
    one_hot = (cls_iota == tgt).astype(jnp.float32)                  # (C, TL)

    # label smoothing: clamp(one_hot, smooth/(C-1), 1 - smooth)
    oh_smooth = jnp.clip(one_hot, smooth / (num_class - 1), 1.0 - smooth)

    # pt = sum_c(one_hot_smoothed * prob) + smooth   (cheap sublane reduce)
    pt = jnp.sum(oh_smooth * prob, axis=0, keepdims=True) + smooth   # (1, TL)
    logpt = jnp.log(pt)

    # per-element alpha gather via the unsmoothed one-hot
    alpha_row = jnp.sum(one_hot * alpha, axis=0, keepdims=True)      # (1, TL)

    # (1 - pt)**gamma.  Clamp the base (rounding can push pt just above 1);
    # small integer gammas lower to repeated multiplies (no EUP exp/log).
    base = jnp.maximum(1.0 - pt, 0.0)
    g = float(gamma)
    if g == 2.0:
        focal = base * base
    elif g.is_integer() and 0.0 < g <= 4.0:
        focal = base
        for _ in range(int(g) - 1):
            focal = focal * base
    else:
        focal = jnp.power(base, g)

    loss = (-1.0) * alpha_row * focal * logpt                        # (1, TL)

    if needs_mask:
        # Zero out padded lanes (only compiled in when HW % tile != 0).
        block = loss.shape[1]
        lane = jax.lax.broadcasted_iota(jnp.int32, loss.shape, 1)
        global_lane = j * block + lane
        loss = jnp.where(global_lane < valid_lanes, loss, 0.0)

    # Lane-wise partial sums only; the cross-lane collapse happens once.
    acc_ref[...] += loss

    @pl.when(j == pl.num_programs(1) - 1)
    def _():
        out_ref[...] = jnp.sum(acc_ref[...], keepdims=True)          # (1, 1)


def focal_loss(logit, target, *, apply_nonlin=None, alpha=None, gamma=2.0,
               balance_index=0, smooth=1e-5, size_average=True,
               block_lanes=2048):
    """Pallas-backed equivalent of FocalLoss.forward.

    apply_nonlin: None, a callable (applied in the wrapper, like torch), or
    the string "softmax" to fuse a class-axis softmax into the kernel
    (saves one full HBM round-trip over the logits).
    """
    if smooth is not None and (smooth < 0 or smooth > 1.0):
        raise ValueError("smooth value should be in [0,1]")
    smooth_f = 0.0 if smooth is None else float(smooth)

    fuse_softmax = False
    if isinstance(apply_nonlin, str):
        if apply_nonlin != "softmax":
            raise ValueError("only apply_nonlin='softmax' can be fused")
        fuse_softmax = True
    elif apply_nonlin is not None:
        logit = apply_nonlin(logit)

    num_class = logit.shape[1]

    # ---- glue: keep the natural NCHW memory layout. (N,C,H,W)->(N,C,HW) is a
    # free reshape; HW becomes the lane axis, C the sublane axis.  No HBM
    # transpose pass before the kernel.
    if logit.ndim > 2:
        n = logit.shape[0]
        logit = logit.reshape(n, num_class, -1)                # (N, C, HW)
    else:
        n = 1
        logit = logit.T.reshape(1, num_class, -1)              # (1, C, M)
    logit = logit.astype(jnp.float32)
    hw = logit.shape[2]
    m = n * hw
    target = target.reshape(n, 1, hw).astype(jnp.int32)        # (N, 1, HW)

    # ---- alpha setup (mirrors the torch constructor paths) ----
    if alpha is None:
        alpha_vec = jnp.ones((num_class,), jnp.float32)
    elif isinstance(alpha, (list, tuple)):
        a = jnp.asarray(alpha, jnp.float32)
        assert a.shape[0] == num_class
        alpha_vec = a / a.sum()
    elif isinstance(alpha, float):
        alpha_vec = jnp.full((num_class,), 1.0 - alpha, jnp.float32)
        alpha_vec = alpha_vec.at[balance_index].set(alpha)
    else:
        raise TypeError("Not support alpha type")
    alpha_2d = alpha_vec.reshape(num_class, 1)                 # (C, 1)

    # ---- lane-axis tiling: big blocks (multiple of 128) for HBM roofline.
    block_lanes = _round_up(max(int(block_lanes), 128), 128)
    block_lanes = min(block_lanes, _round_up(hw, 128))
    hw_pad = _round_up(hw, block_lanes)
    needs_mask = hw_pad != hw
    if needs_mask:
        # Pad with neutral values; padded lanes are zeroed inside the kernel
        # with a single compare+select (works for any gamma and for the
        # fused-softmax path).
        logit = jnp.pad(logit, ((0, 0), (0, 0), (0, hw_pad - hw)),
                        constant_values=0.0)
        target = jnp.pad(target, ((0, 0), (0, 0), (0, hw_pad - hw)),
                         constant_values=0)

    grid = (n, hw_pad // block_lanes)
    kernel = functools.partial(_focal_loss_kernel,
                               smooth=smooth_f, gamma=float(gamma),
                               fuse_softmax=fuse_softmax, valid_lanes=hw,
                               needs_mask=needs_mask)

    partial = pl.pallas_call(
        kernel,
        out_shape=jax.ShapeDtypeStruct((n, 1, 1), jnp.float32),
        grid_spec=pltpu.PrefetchScalarGridSpec(
            num_scalar_prefetch=0,
            grid=grid,
            in_specs=[
                pl.BlockSpec((None, num_class, block_lanes),
                             lambda b, j: (b, 0, j)),
                pl.BlockSpec((None, 1, block_lanes),
                             lambda b, j: (b, 0, j)),
                pl.BlockSpec((num_class, 1), lambda b, j: (0, 0)),
            ],
            out_specs=pl.BlockSpec((None, 1, 1), lambda b, j: (b, 0, 0)),
            scratch_shapes=[pltpu.VMEM((1, block_lanes), jnp.float32)],
        ),
        compiler_params=pltpu.CompilerParams(
            dimension_semantics=("parallel", "arbitrary")),
    )(logit, target, alpha_2d)

    total = jnp.sum(partial)
    if size_average:
        total = total / jnp.float32(m)
    return total


def _focal_loss_ref(logit, target, *, gamma=2.0, smooth=1e-5):
    """Plain-JAX reference (mirrors the torch code) for a correctness check."""
    num_class = logit.shape[1]
    n, c = logit.shape[0], logit.shape[1]
    logit = jnp.transpose(logit.reshape(n, c, -1), (0, 2, 1)).reshape(-1, c)
    target = target.reshape(-1)
    one_hot = jax.nn.one_hot(target, num_class, dtype=jnp.float32)
    one_hot_s = jnp.clip(one_hot, smooth / (num_class - 1), 1.0 - smooth)
    pt = jnp.sum(one_hot_s * logit, axis=1) + smooth
    logpt = jnp.log(pt)
    alpha = jnp.ones((num_class,), jnp.float32)[target]
    loss = -alpha * jnp.power(1.0 - pt, gamma) * logpt
    return loss.mean()


if __name__ == "__main__":
    key = jax.random.PRNGKey(0)
    k1, k2, k3, k4 = jax.random.split(key, 4)

    # Primary shapes (consistent with a dense segmentation head).
    N, C, H, W = 2, 4, 16, 16
    raw_logits = jax.random.normal(k1, (N, C, H, W), jnp.float32)
    target = jax.random.randint(k2, (N, 1, H, W), 0, C, jnp.int32)

    # 1) Fused-softmax path (the fast path).
    loss_fused = focal_loss(raw_logits, target, apply_nonlin="softmax",
                            alpha=None, gamma=2.0, smooth=1e-5,
                            size_average=True)
    loss_fused = jax.block_until_ready(loss_fused)

    # 2) Callable-nonlin path (matches the torch call convention exactly).
    nonlin = lambda x: jax.nn.softmax(x, axis=1)
    loss_callable = focal_loss(raw_logits, target, apply_nonlin=nonlin,
                               alpha=None, gamma=2.0, smooth=1e-5,
                               size_average=True)
    loss_callable = jax.block_until_ready(loss_callable)

    ref = _focal_loss_ref(nonlin(raw_logits), target, gamma=2.0, smooth=1e-5)
    assert jnp.allclose(loss_fused, ref, rtol=5e-5, atol=1e-6), (loss_fused, ref)
    assert jnp.allclose(loss_callable, ref, rtol=5e-5, atol=1e-6), (loss_callable, ref)

    # 3) Ragged spatial extent (exercises the lane-padding mask path).
    H2, W2 = 7, 9
    raw2 = jax.random.normal(k3, (N, C, H2, W2), jnp.float32)
    tgt2 = jax.random.randint(k4, (N, 1, H2, W2), 0, C, jnp.int32)
    loss2 = focal_loss(raw2, tgt2, apply_nonlin="softmax",
                       alpha=None, gamma=2.0, smooth=1e-5, size_average=True)
    loss2 = jax.block_until_ready(loss2)
    ref2 = _focal_loss_ref(nonlin(raw2), tgt2, gamma=2.0, smooth=1e-5)
    assert jnp.allclose(loss2, ref2, rtol=5e-5, atol=1e-6), (loss2, ref2)

    print("KERNEL_OK")
</pallas_src>

<mosaic_0001>
module attributes {stable_mosaic.version = 11 : i64} {
  func.func @_focal_loss_kernel(%arg0: i32, %arg1: i32, %arg2: memref<1x4x256xf32, #tpu.memory_space<vmem>>, %arg3: memref<1x1x256xi32, #tpu.memory_space<vmem>>, %arg4: memref<4x1xf32, #tpu.memory_space<vmem>>, %arg5: memref<1x1x1xf32, #tpu.memory_space<vmem>>, %arg6: memref<1x256xf32, #tpu.memory_space<vmem>>) attributes {dimension_semantics = [#tpu.dimension_semantics<parallel>, #tpu.dimension_semantics<arbitrary>], iteration_bounds = array<i64: 2, 1>, scalar_prefetch = 0 : i64, scratch_operands = 1 : i64, tpu.core_type = #tpu.core_type<tc>, window_params = [{transform_indices = @transform_0, window_bounds = array<i64: 1, 4, 256>}, {transform_indices = @transform_1, window_bounds = array<i64: 1, 1, 256>}, {pipeline_mode = #tpu.pipeline_mode<synchronous>, transform_indices = @transform_2, window_bounds = array<i64: 4, 1>}, {transform_indices = @transform_3, window_bounds = array<i64: 1, 1, 1>}]} {
    %c0_i32 = arith.constant 0 : i32
    %0 = arith.cmpi eq, %arg1, %c0_i32 : i32
    %1 = arith.extui %0 : i1 to i32
    %c0_i32_0 = arith.constant 0 : i32
    %2 = arith.cmpi ne, %1, %c0_i32_0 : i32
    scf.if %2 {
      %cst_23 = arith.constant 0.000000e+00 : f32
      %51 = vector.broadcast %cst_23 : f32 to vector<1x256xf32>
      %c0_24 = arith.constant 0 : index
      %c0_25 = arith.constant 0 : index
      %52 = vector.load %arg6[%c0_24, %c0_25] : memref<1x256xf32, #tpu.memory_space<vmem>>, vector<1x256xf32>
      tpu.vector_store %arg6[%c0_24, %c0_25], %51 {strides = array<i32>} : memref<1x256xf32, #tpu.memory_space<vmem>>, vector<1x256xf32>,
    } else {
    }
    %c0 = arith.constant 0 : index
    %c0_1 = arith.constant 0 : index
    %c0_2 = arith.constant 0 : index
    %3 = vector.load %arg2[%c0, %c0_1, %c0_2] : memref<1x4x256xf32, #tpu.memory_space<vmem>>, vector<1x4x256xf32>
    %4 = vector.shape_cast %3 : vector<1x4x256xf32> to vector<4x256xf32>
    %c0_3 = arith.constant 0 : index
    %c0_4 = arith.constant 0 : index
    %c0_5 = arith.constant 0 : index
    %5 = vector.load %arg3[%c0_3, %c0_4, %c0_5] : memref<1x1x256xi32, #tpu.memory_space<vmem>>, vector<1x1x256xi32>
    %6 = vector.shape_cast %5 : vector<1x1x256xi32> to vector<1x256xi32>
    %c0_6 = arith.constant 0 : index
    %c0_7 = arith.constant 0 : index
    %7 = vector.load %arg4[%c0_6, %c0_7] : memref<4x1xf32, #tpu.memory_space<vmem>>, vector<4x1xf32>
    %cst = arith.constant dense<0xFF800000> : vector<256xf32>
    %8 = vector.multi_reduction <maximumf>, %4, %cst [0] : vector<4x256xf32> to vector<256xf32>
    %9 = vector.shape_cast %8 : vector<256xf32> to vector<1x256xf32>
    %10 = vector.broadcast %9 : vector<1x256xf32> to vector<4x256xf32>
    %11 = arith.subf %4, %10 : vector<4x256xf32>
    %12 = math.exp %11 : vector<4x256xf32>
    %cst_8 = arith.constant dense<0.000000e+00> : vector<256xf32>
    %13 = vector.multi_reduction <add>, %12, %cst_8 [0] : vector<4x256xf32> to vector<256xf32>
    %14 = vector.shape_cast %13 : vector<256xf32> to vector<1x256xf32>
    %15 = vector.broadcast %14 : vector<1x256xf32> to vector<4x256xf32>
    %16 = arith.divf %12, %15 : vector<4x256xf32>
    %17 = tpu.iota {dimensions = array<i32: 0>} : vector<4x256xi32>
    %18 = vector.broadcast %6 : vector<1x256xi32> to vector<4x256xi32>
    %19 = arith.cmpi eq, %17, %18 : vector<4x256xi32>
    %20 = arith.extui %19 : vector<4x256xi1> to vector<4x256xi32>
    %21 = arith.sitofp %20 : vector<4x256xi32> to vector<4x256xf32>
    %cst_9 = arith.constant 3.33333332E-6 : f32
    %cst_10 = arith.constant 0.999989986 : f32
    %22 = vector.broadcast %cst_9 : f32 to vector<4x256xf32>
    %23 = arith.maximumf %22, %21 : vector<4x256xf32>
    %24 = vector.broadcast %cst_10 : f32 to vector<4x256xf32>
    %25 = arith.minimumf %24, %23 : vector<4x256xf32>
    %26 = arith.mulf %25, %16 : vector<4x256xf32>
    %cst_11 = arith.constant dense<0.000000e+00> : vector<256xf32>
    %27 = vector.multi_reduction <add>, %26, %cst_11 [0] : vector<4x256xf32> to vector<256xf32>
    %28 = vector.shape_cast %27 : vector<256xf32> to vector<1x256xf32>
    %cst_12 = arith.constant 9.99999974E-6 : f32
    %29 = vector.broadcast %cst_12 : f32 to vector<1x256xf32>
    %30 = arith.addf %28, %29 : vector<1x256xf32>
    %31 = math.log %30 : vector<1x256xf32>
    %32 = vector.broadcast %7 : vector<4x1xf32> to vector<4x256xf32>
    %33 = arith.mulf %21, %32 : vector<4x256xf32>
    %cst_13 = arith.constant dense<0.000000e+00> : vector<256xf32>
    %34 = vector.multi_reduction <add>, %33, %cst_13 [0] : vector<4x256xf32> to vector<256xf32>
    %35 = vector.shape_cast %34 : vector<256xf32> to vector<1x256xf32>
    %cst_14 = arith.constant 1.000000e+00 : f32
    %36 = vector.broadcast %cst_14 : f32 to vector<1x256xf32>
    %37 = arith.subf %36, %30 : vector<1x256xf32>
    %cst_15 = arith.constant 0.000000e+00 : f32
    %38 = vector.broadcast %cst_15 : f32 to vector<1x256xf32>
    %39 = arith.maximumf %37, %38 : vector<1x256xf32>
    %40 = arith.mulf %39, %39 : vector<1x256xf32>
    %cst_16 = arith.constant -1.000000e+00 : f32
    %41 = vector.broadcast %cst_16 : f32 to vector<1x256xf32>
    %42 = arith.mulf %41, %35 : vector<1x256xf32>
    %43 = arith.mulf %42, %40 : vector<1x256xf32>
    %44 = arith.mulf %43, %31 : vector<1x256xf32>
    %c0_17 = arith.constant 0 : index
    %c0_18 = arith.constant 0 : index
    %45 = vector.load %arg6[%c0_17, %c0_18] : memref<1x256xf32, #tpu.memory_space<vmem>>, vector<1x256xf32>
    %46 = arith.addf %45, %44 : vector<1x256xf32>
    %c0_19 = arith.constant 0 : index
    %c0_20 = arith.constant 0 : index
    %47 = vector.load %arg6[%c0_19, %c0_20] : memref<1x256xf32, #tpu.memory_space<vmem>>, vector<1x256xf32>
    tpu.vector_store %arg6[%c0_19, %c0_20], %46 {strides = array<i32>} : memref<1x256xf32, #tpu.memory_space<vmem>>, vector<1x256xf32>,
    %c0_i32_21 = arith.constant 0 : i32
    %48 = arith.cmpi eq, %arg1, %c0_i32_21 : i32
    %49 = arith.extui %48 : i1 to i32
    %c0_i32_22 = arith.constant 0 : i32
    %50 = arith.cmpi ne, %49, %c0_i32_22 : i32
    scf.if %50 {
      %c0_23 = arith.constant 0 : index
      %c0_24 = arith.constant 0 : index
      %51 = vector.load %arg6[%c0_23, %c0_24] : memref<1x256xf32, #tpu.memory_space<vmem>>, vector<1x256xf32>
      %52 = vector.shape_cast %51 : vector<1x256xf32> to vector<1x1x256xf32>
      %cst_25 = arith.constant dense<0.000000e+00> : vector<1xf32>
      %53 = vector.multi_reduction <add>, %52, %cst_25 [1, 2] : vector<1x1x256xf32> to vector<1xf32>
      %54 = vector.shape_cast %53 : vector<1xf32> to vector<1x1x1xf32>
      %55 = vector.extract %54[0, 0, 0] : f32 from vector<1x1x1xf32>
      %56 = vector.broadcast %55 : f32 to vector<1x1xf32>
      %c0_26 = arith.constant 0 : index
      %c0_27 = arith.constant 0 : index
      %c0_28 = arith.constant 0 : index
      %57 = vector.load %arg5[%c0_26, %c0_27, %c0_28] : memref<1x1x1xf32, #tpu.memory_space<vmem>>, vector<1x1x1xf32>
      %58 = vector.shape_cast %57 : vector<1x1x1xf32> to vector<1x1xf32>
      %59 = vector.shape_cast %56 : vector<1x1xf32> to vector<1x1x1xf32>
      tpu.vector_store %arg5[%c0_26, %c0_27, %c0_28], %59 {strides = array<i32>} : memref<1x1x1xf32, #tpu.memory_space<vmem>>, vector<1x1x1xf32>,
    } else {
    }
    return
  }
  func.func @transform_0(%arg0: i32, %arg1: i32) -> (i32, i32, i32) {
    %c0_i32 = arith.constant 0 : i32
    %c0_i32_0 = arith.constant 0 : i32
    return %arg0, %c0_i32, %arg1 : i32, i32, i32
  }
  func.func @transform_1(%arg0: i32, %arg1: i32) -> (i32, i32, i32) {
    %c0_i32 = arith.constant 0 : i32
    %c0_i32_0 = arith.constant 0 : i32
    return %arg0, %c0_i32, %arg1 : i32, i32, i32
  }
  func.func @transform_2(%arg0: i32, %arg1: i32) -> (i32, i32) {
    %c0_i32 = arith.constant 0 : i32
    %c0_i32_0 = arith.constant 0 : i32
    %c0_i32_1 = arith.constant 0 : i32
    return %c0_i32, %c0_i32_0 : i32, i32
  }
  func.func @transform_3(%arg0: i32, %arg1: i32) -> (i32, i32, i32) {
    %c0_i32 = arith.constant 0 : i32
    %c0_i32_0 = arith.constant 0 : i32
    %c0_i32_1 = arith.constant 0 : i32
    return %arg0, %c0_i32, %c0_i32_0 : i32, i32, i32
  }
}

</mosaic_0001>

<bundles_post_ra>
// kernel: tpu_custom_call.1
= control target key start
LH: loop header
LB: loop body
LE: loop exit
PB: predicated region body
PF: predicated region fallthrough
CT: control target
= control target key end

     0   :  { %8 = vsyncpa [#allocation4], 0  ;;  %s871_s0 = inlined_call_operand.hbm [shape: f32[2,4,256], index: 0, kind: input, shape index: {}]   ;;  %s872_s1 = inlined_call_operand.vmem [shape: s32[2,1,256], index: 1, kind: input, shape index: {}]   ;;  %s873_s2 = inlined_call_operand.vmem [shape: f32[4,1], index: 2, kind: input, shape index: {}]   ;;  %s874_s3 = inlined_call_operand.vmem [shape: f32[2,1,1], index: 3, kind: output, shape index: {}]  }
   0x1   :  { %10 = vsyncpa [#allocation4 + $0x1], 0  ;;  %s705_s12 = smov 0   ;;  %s707_s13 = smov 0  }
   0x2   :  { %s709_s14 = smov 0   ;;  %s711_s15 = smov 0  }
   0x3   :  { %s713_s16 = smov 0   ;;  %s715_s17 = smov 0  }
   0x4 LB: > { %s514_s18 = sadd.s32 4294967295, %s679_s17   ;;  %s28_s19 = sadd.s32 1, %s675_s16  ;;  %s679_s17 = sphi %s715_s17, %s16_s17   ;;  %s675_s16 = sphi %s713_s16, %s886_s16   ;;  %s671_s15 = sphi %s711_s15, %s885_s15   ;;  %s667_s14 = sphi %s709_s14, %s884_s14   ;;  %s663_s13 = sphi %s707_s13, %s883_s13   ;;  %s659_s12 = sphi %s705_s12, %s882_s12  }
   0x5   : > { %p30_p0 = scmp.ge.s32.totalorder %s28_s19, 2  ;;  %s37_s20 = sadd.s32 1, %s667_s14 }
   0x6   : > { %p44_p1 = scmp.ne.s32.totalorder %s667_s14, %s663_s13  ;;  %p45_p2 = scmp.eq.s32.totalorder %s679_s17, 0 }
   0x7   : > { %s888_s19 = smov (%p30_p0, %s28_s19), 0  ;;  %p50_p4 = scmp.ne.s32.totalorder %s663_s13, %s659_s12 }
   0x8   : > { %p741_p3 = por %p45_p2, %p44_p1  ;;  %s32_s22 = ssub.s32 %s675_s16, %s888_s19 }
   0x9   : > { %p51_p5 = scmp.eq.s32.totalorder %s514_s18, 0  ;;  %p35_p6 = scmp.eq.s32.totalorder %s32_s22, 0 }
   0xa   : > { %p537_p8 = scmp.lt.s32.totalorder %s679_s17, 2  ;;  %s152_s25 = sand.u32 1, %s667_s14  }
   0xb   : > { %p748_p7 = por %p51_p5, %p50_p4  ;;  %s528_s26 = sshll.u32 %s675_s16, 7 }
   0xc   : > { %s754_s24 = scalar_select %p35_p6, %s667_s14, %s37_s20  }
   0xd   : > { %s518_s27 = sshll.u32 %s152_s25, 3  ;;  %s761_s30 = scalar_lea.hbm %s871_s0, %s528_s26 }
   0xe   : > { %s156_s4 = scalar_lea.vmem [#allocation3], %s518_s27  ;;  %p765_p9 = pnand %p537_p8, %p741_p3 }
   0xf   : > { %s166_s5 = sshll.u32 %s156_s4, 4  ;;  %s153_s7 = scalar_lea.sflag [#allocation4], %s152_s25  ;;  %s769_s5 = int_to_ptr.vmem [resolvable:$true] %s166_s5 }
  0x10   : > { %s599_s8 = scalar_lea.hbm %s761_s30, 128  ;;  %p601_p13 = pneg %p765_p9 }
  0x11   : > { %p600_p12 = scmp.ne.s32.totalorder %s761_s30, %s599_s8  ;;  %s604_s11 = scalar_lea.hbm %s871_s0, 256 }
  0x12   : > { %p605_p2 = scmp.lt.u32.totalorder %s761_s30, %s871_s0  ;;  %p606_p3 = scmp.lt.u32.totalorder %s604_s11, %s599_s8 }
  0x13   : > { %p602_p0 = pnand %p601_p13, %p600_p12  ;;  %p608_p5 = scmp.lt.u32.totalorder %s599_s8, %s761_s30 }
  0x14   : > { %p607_p4 = por %p606_p3, %p605_p2 }
  0x15   : > { %p603_p1 = pneg %p602_p0 }
  0x16   : > { %p609_p6 = por %p608_p5, %p607_p4 }
  0x18   : > { %p610_p8 = pnand %p609_p6, %p603_p1 }
  0x1a   : > { %613 = shalt.err (!%p610_p8)
}
  0x1b   : > { %s614_s20 = scalar_lea.vmem %s769_s5, 128  ;;  %s681_s21 = smov [#allocation3]  }
  0x1c   : > { %p615_p12 = scmp.ne.s32.totalorder %s769_s5, %s614_s20  ;;  %s619_s22 = sshll.u32 %s681_s21, 4  ;;  %s620_s22 = int_to_ptr.vmem [resolvable:$false] %s619_s22 }
  0x1d   : > { %s621_s25 = scalar_lea.vmem %s620_s22, 256  ;;  %p622_p11 = scmp.lt.s32.totalorder %s769_s5, %s620_s22 }
  0x1e   : > { %p617_p0 = pnand %p615_p12, %p601_p13  ;;  %p623_p2 = scmp.lt.s32.totalorder %s621_s25, %s614_s20 }
  0x20   : > { %p618_p10 = pneg %p617_p0  ;;  %p624_p3 = por %p623_p2, %p622_p11 }
  0x22   : > { %p625_p4 = pnand %p624_p3, %p618_p10 }
  0x24   : > { %628 = shalt.err (!%p625_p4)
}
  0x25   : > { %536 = dma.hbm_to_vmem [thread:$0]  (!%p765_p9), %s761_s30, 128, %s769_s5, %s153_s7  }
  0x26   : > { %p878_p1 = scmp.lt.s32.totalorder %s679_s17, 3  ;;  %p879_p5 = scmp.ge.s32.totalorder %s679_s17, 1 }
  0x28   : > { %p184_p13 = pnand %p879_p5, %p878_p1 }
  0x29   : > { %s189_s26 = sand.u32 (!%p184_p13), 1, %s663_s13  }
  0x2a   : > { %187 = sbr.rel (%p184_p13) target bundleno = 428 (0x1ac), region = 32  ;;  %s522_s27 = sshll.u32 (!%p184_p13), %s189_s26, 3 }
  0x2b   : > { %s190_s28 = scalar_lea.sflag (!%p184_p13), [#allocation4], %s189_s26  ;;  %s193_s29 = scalar_lea.vmem (!%p184_p13), [#allocation3], %s522_s27 }
  0x31   : > { %654 = dma.done.wait (%p748_p7), %s190_s28, 128  }
  0x32   : > { %656 = vsyncadd (%p748_p7), %s190_s28, 4294967168  ;;  %p224_p10 = scmp.lt.s32.totalorder %s671_s15, 1  ;;  %v239_v0 = vlaneseq  ;;  %v682_v1 = vmov 0   ;;  %v683_v4 = vmov 0.0   ;;  %vm250_vm1 = vcmask 1043456   ;;  %v244_v8 = vld [vmem:[%s193_s29] sm:$0xff] }
  0x33   : > { %589 = vset.pattern.permute.xlu0 %v682_v1  ;;  %v246_v7 = vld [vmem:[%s873_s2] sm:$0xf]  ;;  %v248_v10 = vcombine.high %v244_v8, %v244_v8  ;;  %v251_v11 = vsel %vm250_vm1, %v244_v8, -inf  ;;  %vm413_vm4 = vcmask 1040384   ;;  %vm427_vm5 = vcmask 0  }
  0x34   : > { %s890_s15 = smov (!%p224_p10, %s671_s15), 1  ;;  %vm811_vm0 = vcmp.lt.s32.totalorder %v239_v0, 256  ;;  %v815_v3 = vshrl.u32 %v239_v0, 7  ;;  %342 = vperm.xlu0 %589, %v246_v7   ;;  %v252_v14 = vrot.slane %v251_v11, 4 }
  0x35   : > { %243 = vst.msk [vmem:[#allocation2] sm:$0x3] %vm811_vm0, %v683_v4  ;;  %s523_s23 = sshll.u32 %s890_s15, 1  ;;  %v258_v15 = vsel %vm250_vm1, %v248_v10, -inf  ;;  %s234_s10 = scalar_lea.vmem %s874_s3, %s890_s15 }
  0x36   : > { %v299_v5 = vsub.s32 0, %v815_v3  ;;  %v303_v6 = vsub.s32 1, %v815_v3  ;;  %s230_s5 = scalar_lea.vmem %s872_s1, %s523_s23  ;;  %v253_v16 = vmax.f32 %v251_v11, %v252_v14  ;;  %v259_v17 = vrot.slane %v258_v15, 4 }
  0x37   : > { %v245_v9 = vld [vmem:[%s230_s5] sm:$0x3] }
  0x38   : > { %v300_v12 = vrot.slane %v245_v9, %v299_v5  ;;  %v304_v13 = vrot.slane %v245_v9, %v303_v6  ;;  %v254_v20 = vrot.slane %v253_v16, 2  ;;  %v260_v21 = vmax.f32 %v258_v15, %v259_v17 }
  0x3a   : > { %vm305_vm2 = vcmp.eq.s32.totalorder %v815_v3, %v300_v12  ;;  %vm306_vm3 = vcmp.eq.s32.totalorder %v815_v3, %v304_v13  ;;  %v255_v22 = vmax.f32 %v253_v16, %v254_v20  ;;  %v261_v23 = vrot.slane %v260_v21, 2 }
  0x3b   : > { %v524_v18 = vsel %vm305_vm2, 1.0, %v683_v4  ;;  %v525_v19 = vsel %vm306_vm3, 1.0, %v683_v4 }
  0x3c   : > { %v256_v24 = vrot.slane %v255_v22, 1  ;;  %v262_v25 = vmax.f32 %v260_v21, %v261_v23  ;;  %v311_v50 = vmax.f32 %v524_v18, 3.3333333e-06  ;;  %v312_v52 = vmax.f32 %v525_v19, 3.3333333e-06 }
  0x3e   : > { %v257_v26 = vmax.f32 %v255_v22, %v256_v24  ;;  %v263_v27 = vrot.slane %v262_v25, 1  ;;  %v313_v53 = vmin.f32 %v311_v50, 0.99999  ;;  %v314_v54 = vmin.f32 %v312_v52, 0.99999 }
  0x40   : > { %v264_v28 = vmax.f32 %v262_v25, %v263_v27 }
  0x42   : > { %v267_v29 = vcombine.low %v257_v26, %v264_v28 }
  0x44   : > { %v269_v30 = vsub.f32 %v244_v8, %v267_v29 }
  0x46   : > { %v270_v31 = vmul.f32 1.442695, %v269_v30 }
  0x48   : > { %591 = vpow2.f32 %v270_v31 }
  0x52   : > { %v592_v32 = vpop.eup %591 }
  0x53   : > { %v273_v33 = vcombine.high %v592_v32, %v592_v32  ;;  %v275_v34 = vsel %vm250_vm1, %v592_v32, 0.0 }
  0x54   : > { %v276_v36 = vrot.slane %v275_v34, 4 }
  0x55   : > { %v282_v35 = vsel %vm250_vm1, %v273_v33, 0.0 }
  0x56   : > { %v283_v37 = vrot.slane %v282_v35, 4  ;;  %v277_v38 = vadd.f32 %v276_v36, %v275_v34 }
  0x58   : > { %v284_v39 = vadd.f32 %v283_v37, %v282_v35  ;;  %v278_v40 = vrot.slane %v277_v38, 2 }
  0x5a   : > { %v285_v41 = vrot.slane %v284_v39, 2  ;;  %v279_v42 = vadd.f32 %v278_v40, %v277_v38 }
  0x5c   : > { %v286_v43 = vadd.f32 %v285_v41, %v284_v39  ;;  %v280_v44 = vrot.slane %v279_v42, 1 }
  0x5e   : > { %v287_v45 = vrot.slane %v286_v43, 1  ;;  %v281_v46 = vadd.f32 %v280_v44, %v279_v42 }
  0x60   : > { %v288_v47 = vadd.f32 %v287_v45, %v286_v43 }
  0x62   : > { %v291_v48 = vcombine.low %v281_v46, %v288_v47 }
  0x64   : > { %593 = vrcp.f32 %v291_v48 }
  0x6e   : > { %v594_v49 = vpop.eup %593 }
  0x6f   : > { %v294_v51 = vmul.f32 %v594_v49, %v592_v32 }
  0x71   : > { %v316_v55 = vcombine.high %v294_v51, %v294_v51  ;;  %v318_v56 = vmul.f32 %v313_v53, %v294_v51  ;;  %v373_v53 = vld [vmem:[#allocation2] sm:$0x3] }
  0x73   : > { %v319_v57 = vmul.f32 %v316_v55, %v314_v54  ;;  %v320_v58 = vsel %vm250_vm1, %v318_v56, 0.0 }
  0x74   : > { %v321_v60 = vrot.slane %v320_v58, 4 }
  0x75   : > { %v327_v59 = vsel %vm250_vm1, %v319_v57, 0.0 }
  0x76   : > { %v328_v61 = vrot.slane %v327_v59, 4  ;;  %v322_v62 = vadd.f32 %v321_v60, %v320_v58 }
  0x78   : > { %v329_v63 = vadd.f32 %v328_v61, %v327_v59  ;;  %v323_v0 = vrot.slane %v322_v62, 2 }
  0x7a   : > { %v330_v1 = vrot.slane %v329_v63, 2  ;;  %v324_v4 = vadd.f32 %v323_v0, %v322_v62 }
  0x7c   : > { %v331_v7 = vadd.f32 %v330_v1, %v329_v63  ;;  %v325_v8 = vrot.slane %v324_v4, 1 }
  0x7e   : > { %v332_v9 = vrot.slane %v331_v7, 1  ;;  %v326_v10 = vadd.f32 %v325_v8, %v324_v4 }
  0x80   : > { %v333_v11 = vadd.f32 %v332_v9, %v331_v7  ;;  %v334_v12 = vadd.f32 1e-05, %v326_v10 }
  0x82   : > { %v335_v13 = vadd.f32 1e-05, %v333_v11  ;;  %595 = vlog2.f32 %v334_v12  ;;  %v361_v25 = vsub.f32 1.0, %v334_v12 }
  0x84   : > { %597 = vlog2.f32 %v335_v13  ;;  %v362_v26 = vsub.f32 1.0, %v335_v13  ;;  %v363_v31 = vmax.f32 %v361_v25, 0.0 }
  0x86   : > { %v364_v32 = vmax.f32 %v362_v26, 0.0  ;;  %v365_v39 = vmul.f32 %v363_v31, %v363_v31 }
  0x88   : > { %v366_v40 = vmul.f32 %v364_v32, %v364_v32 }
  0x8c   : > { %v596_v33 = vpop.eup %595 }
  0x8d   : > { %v337_v42 = vmul.f32 0.6931472, %v596_v33 }
  0x8e   : > { %v598_v36 = vpop.eup %597 }
  0x8f   : > { %v339_v43 = vmul.f32 0.6931472, %v598_v36 }
  0xb3   : > { %v343_v14 = vpop.permute.xlu0 %342 }
  0xb4   : > { %v345_v15 = vmul.f32 %v524_v18, %v343_v14  ;;  %v346_v16 = vmul.f32 %v525_v19, %v343_v14  ;;  %v684_v18 = vmov 1966171168  }
  0xb5   : > { %v378_v19 = vunpack.c.l.s4 %v684_v18 }
  0xb6   : > { %v347_v17 = vsel %vm250_vm1, %v345_v15, 0.0  ;;  %v354_v20 = vsel %vm250_vm1, %v346_v16, 0.0 }
  0xb7   : > { %v348_v21 = vrot.slane %v347_v17, 4  ;;  %v355_v22 = vrot.slane %v354_v20, 4  ;;  %v379_v41 = vunpack.c.0.s8 %v378_v19 }
  0xb9   : > { %v349_v23 = vadd.f32 %v348_v21, %v347_v17  ;;  %v356_v24 = vadd.f32 %v355_v22, %v354_v20  ;;  %v382_v48 = vsub.s32 %v379_v41, %v815_v3 }
  0xbb   : > { %v350_v27 = vrot.slane %v349_v23, 2  ;;  %v357_v28 = vrot.slane %v356_v24, 2 }
  0xbd   : > { %v351_v29 = vadd.f32 %v350_v27, %v349_v23  ;;  %v358_v30 = vadd.f32 %v357_v28, %v356_v24 }
  0xbf   : > { %v352_v34 = vrot.slane %v351_v29, 1  ;;  %v359_v35 = vrot.slane %v358_v30, 1 }
  0xc1   : > { %v353_v37 = vadd.f32 %v352_v34, %v351_v29  ;;  %v360_v38 = vadd.f32 %v359_v35, %v358_v30 }
  0xc3   : > { %v367_v44 = vmul.f32 -1.0, %v353_v37  ;;  %v368_v45 = vmul.f32 -1.0, %v360_v38 }
  0xc5   : > { %v369_v46 = vmul.f32 %v367_v44, %v365_v39  ;;  %v370_v47 = vmul.f32 %v368_v45, %v366_v40 }
  0xc7   : > { %v371_v49 = vmul.f32 %v369_v46, %v337_v42  ;;  %v372_v50 = vmul.f32 %v370_v47, %v339_v43 }
  0xc9   : > { %v376_v51 = vcombine.low %v371_v49, %v372_v50 }
  0xcb   : > { %v383_v52 = vrot.slane %v376_v51, %v382_v48 }
  0xcd   : > { %v390_v54 = vrot.slane %v383_v52, %v382_v48 }
  0xcf   : > { %v392_v55 = vadd.f32 %v390_v54, %v373_v53 }
  0xd1   : > { %397 = vst.msk [vmem:[#allocation2] sm:$0x3] %vm811_vm0, %v392_v55 }
  0xd8   : > { %v401_v56 = vld [vmem:[#allocation2] sm:$0x3] }
  0xd9   : > { %v406_v57 = vrot.slane %v401_v56, %v299_v5  ;;  %v410_v58 = vrot.slane %v401_v56, %v303_v6 }
  0xdb   : > { %v414_v59 = vsel %vm413_vm4, %v406_v57, 0.0  ;;  %v415_v60 = vsel %vm413_vm4, %v410_v58, 0.0 }
  0xdc   : > { %v416_v61 = vadd.f32 %v415_v60, %v414_v59 }
  0xde   : > { %417 = vadd.xlane.f32.xlu0 %v416_v61 }
 0x16b   : > { %v418_v62 = vpop.xlane.xlu0 %417 }
 0x16c   : > { %v419_v63 = vrot.slane %v418_v62, 4 }
 0x16e   : > { %v420_v0 = vadd.f32 %v419_v63, %v418_v62 }
 0x170   : > { %v421_v1 = vrot.slane %v420_v0, 2 }
 0x172   : > { %v422_v4 = vadd.f32 %v421_v1, %v420_v0 }
 0x174   : > { %v423_v2 = vrot.slane %v422_v4, 1 }
 0x176   : > { %v424_v7 = vadd.f32 %v423_v2, %v422_v4 }
 0x178   : > { %529 = vpush %v424_v7 }
 0x1a9   : > { %s530_s11 = spop %529 }
 0x1aa   : > { %v426_v3 = vstv %s530_s11 }
 0x1ab   : > { %428 = vst.msk [vmem:[%s234_s10] sm:$0x1] %vm427_vm5, %v426_v3 }
 0x1ac PF: > { %s16_s17 = sadd.s32 1, %s679_s17   ;;  %s882_s12 = smov %s663_s13 }
 0x1ad   : > { %p13_p7 = scmp.ge.s32.totalorder %s16_s17, 4   ;;  %s883_s13 = smov %s667_s14 }
 0x1ae   : > { %s884_s14 = smov %s754_s24  ;;  %s885_s15 = smov %s675_s16 }
 0x1af   : > { %s886_s16 = smov %s888_s19  ;;  %15 = sbr.rel (!%p13_p7) target bundleno = 4 (0x4), region = 83 }
 0x1b6   :  { %446 = vsyncpa [#allocation4], 1 }
 0x1b7   :  { %448 = vsyncpa [#allocation4 + $0x1], 1 }

</bundles_post_ra>
